<compile_context>
chip_gen: v5e
topology: v5e:2x2
jax: 0.10.0
libtpu: 0.0.40
codegen_flags: <defaults>
</compile_context>

<pallas_src>
import jax
import jax.numpy as jnp
from jax import lax
from jax.experimental import pallas as pl
from jax.experimental.pallas import tpu as pltpu


DROP_P = 0.2
_DROP_THRESHOLD = int(round(DROP_P * (1 << 32)))   # keep iff bits >= threshold
_KEEP_SCALE = 1.0 / (1.0 - DROP_P)
LANE = 128                                          # padded hidden / class width


def _round_up(n, m):
    return ((n + m - 1) // m) * m


def _random_bits(shape, salt):
    """Counter-based hash PRNG (pure jnp uint32 ops; murmur3-style finalizer)."""
    r = lax.broadcasted_iota(jnp.int32, shape, 0).astype(jnp.uint32)
    c = lax.broadcasted_iota(jnp.int32, shape, 1).astype(jnp.uint32)
    x = salt + r * jnp.uint32(0x9E3779B1) + c * jnp.uint32(0x85EBCA77)
    x = x ^ (x >> 16)
    x = x * jnp.uint32(0x7FEB352D)
    x = x ^ (x >> 15)
    x = x * jnp.uint32(0x846CA68B)
    x = x ^ (x >> 16)
    return x


def _dropout(x, salt):
    """Training-mode dropout: keep-prob 0.8, kept values scaled by 1/0.8."""
    bits = _random_bits(x.shape, salt)
    keep = bits >= jnp.uint32(_DROP_THRESHOLD)      # integer compare, no f32 convert
    return jnp.where(keep, x * jnp.float32(_KEEP_SCALE), jnp.float32(0.0))


def mlp_kernel(seed_ref,                         # SMEM scalar-prefetch (1,) int32
               x_ref, w0_ref, b0_ref,
               w1_ref, b1_ref, w2_ref, b2_ref,   # VMEM tiles
               o_ref):                           # VMEM output tile (TILE_B, 128)
    # Per-tile salt so dropout masks differ across batch tiles.
    seed_u = seed_ref[0].astype(jnp.uint32)
    tile_u = pl.program_id(0).astype(jnp.uint32)
    salt = seed_u * jnp.uint32(0x9E3779B1) + tile_u * jnp.uint32(0xC2B2AE35)

    x = x_ref[...]                                               # (TB, Kp) bf16

    # fc0 + relu + dropout (f32 accumulation on the MXU)
    h0 = jnp.dot(x, w0_ref[...], preferred_element_type=jnp.float32) + b0_ref[...]
    h0 = jnp.maximum(h0, 0.0)
    h0 = _dropout(h0, salt + jnp.uint32(1))

    # fc1 + relu + dropout
    h1 = jnp.dot(h0.astype(jnp.bfloat16), w1_ref[...],
                 preferred_element_type=jnp.float32) + b1_ref[...]
    h1 = jnp.maximum(h1, 0.0)
    h1 = _dropout(h1, salt + jnp.uint32(2))

    # fc2 (pad columns carry bias -1e30 so they vanish under log_softmax)
    h2 = jnp.dot(h1.astype(jnp.bfloat16), w2_ref[...],
                 preferred_element_type=jnp.float32) + b2_ref[...]

    # log_softmax over the (padded) class axis — lane-dense (TILE_B, 128) store.
    m = jnp.max(h2, axis=-1, keepdims=True)
    lse = m + jnp.log(jnp.sum(jnp.exp(h2 - m), axis=-1, keepdims=True))
    o_ref[...] = h2 - lse


def model_c_forward(x, params, seed=0, tile_b=512):
    """x: any shape whose element count is a multiple of image_size (NCHW ok)."""
    w0, b0, w1, b1, w2, b2 = params            # weights (in, out), f32
    image_size = w0.shape[0]
    h0_w, h1_w, out_w = w0.shape[1], w1.shape[1], w2.shape[1]   # 100, 50, 10

    x2d = x.reshape(-1, image_size)            # x.view(-1, image_size)
    batch = x2d.shape[0]

    k_pad = _round_up(image_size, LANE)
    tb = min(tile_b, _round_up(batch, 16))     # small batches: one tile
    batch_pad = _round_up(batch, tb)

    # Zero-pad + bf16-cast inputs/weights (pad rows/cols are math-inert).
    xp = jnp.zeros((batch_pad, k_pad), jnp.bfloat16)
    xp = xp.at[:batch, :image_size].set(x2d.astype(jnp.bfloat16))

    w0p = jnp.zeros((k_pad, LANE), jnp.bfloat16).at[:image_size, :h0_w].set(
        w0.astype(jnp.bfloat16))
    b0p = jnp.zeros((1, LANE), jnp.float32).at[:, :h0_w].set(
        b0.reshape(1, -1).astype(jnp.float32))
    w1p = jnp.zeros((LANE, LANE), jnp.bfloat16).at[:h0_w, :h1_w].set(
        w1.astype(jnp.bfloat16))
    b1p = jnp.zeros((1, LANE), jnp.float32).at[:, :h1_w].set(
        b1.reshape(1, -1).astype(jnp.float32))
    w2p = jnp.zeros((LANE, LANE), jnp.bfloat16).at[:h1_w, :out_w].set(
        w2.astype(jnp.bfloat16))
    b2p = jnp.full((1, LANE), -1e30, jnp.float32).at[:, :out_w].set(
        b2.reshape(1, -1).astype(jnp.float32))

    seed_arr = jnp.array([seed], dtype=jnp.int32)
    grid = (batch_pad // tb,)

    tiled = lambda i, seed_ref: (i, 0)         # batch-tiled operands
    resident = lambda i, seed_ref: (0, 0)      # weights / biases stay resident

    flops = 2 * batch_pad * (k_pad * LANE + LANE * LANE + LANE * LANE)
    bytes_accessed = (batch_pad * k_pad * 2 + batch_pad * LANE * 4
                      + (k_pad * LANE + 2 * LANE * LANE) * 2 + 3 * LANE * 4)

    out = pl.pallas_call(
        mlp_kernel,
        out_shape=jax.ShapeDtypeStruct((batch_pad, LANE), jnp.float32),
        grid_spec=pltpu.PrefetchScalarGridSpec(
            num_scalar_prefetch=1,
            grid=grid,
            in_specs=[
                pl.BlockSpec((tb, k_pad), tiled),        # x
                pl.BlockSpec((k_pad, LANE), resident),   # w0
                pl.BlockSpec((1, LANE), resident),       # b0
                pl.BlockSpec((LANE, LANE), resident),    # w1
                pl.BlockSpec((1, LANE), resident),       # b1
                pl.BlockSpec((LANE, LANE), resident),    # w2
                pl.BlockSpec((1, LANE), resident),       # b2
            ],
            out_specs=pl.BlockSpec((tb, LANE), tiled),
        ),
        compiler_params=pltpu.CompilerParams(
            dimension_semantics=("parallel",)),
        cost_estimate=pl.CostEstimate(
            flops=flops,
            transcendentals=batch_pad * LANE,
            bytes_accessed=bytes_accessed),
    )(seed_arr, xp, w0p, b0p, w1p, b1p, w2p, b2p)

    return out[:batch, :out_w]                 # drop pad rows / pad classes


def init_params(image_size, key):
    """Deterministic init matching nn.Linear shapes (weights stored (in, out))."""
    k0, k1, k2, k3, k4, k5 = jax.random.split(key, 6)

    def linear(kw, kb, fan_in, fan_out):
        bound = 1.0 / (fan_in ** 0.5)
        w = jax.random.uniform(kw, (fan_in, fan_out), jnp.float32, -bound, bound)
        b = jax.random.uniform(kb, (fan_out,), jnp.float32, -bound, bound)
        return w, b

    w0, b0 = linear(k0, k1, image_size, 100)
    w1, b1 = linear(k2, k3, 100, 50)
    w2, b2 = linear(k4, k5, 50, 10)
    return (w0, b0, w1, b1, w2, b2)


if __name__ == "__main__":
    key = jax.random.PRNGKey(0)
    kx, kp = jax.random.split(key)

    image_size = 256                    # flattened 16x16 single-channel patch
    x = jax.random.normal(kx, (2, 4, 16, 16), dtype=jnp.float32)  # -> (8, 256)

    params = init_params(image_size, kp)

    out = model_c_forward(x, params, seed=0)
    out = jax.block_until_ready(out)

    assert out.shape == (8, 10), out.shape
    # log_softmax rows must (approximately) exponentiate-sum to 1
    row_sums = jnp.sum(jnp.exp(out), axis=1)
    assert jnp.allclose(row_sums, jnp.ones_like(row_sums), atol=1e-4), row_sums

    print("KERNEL_OK")
</pallas_src>

<mosaic_0001>
module attributes {stable_mosaic.version = 11 : i64} {
  func.func @mlp_kernel(%arg0: i32, %arg1: memref<1xi32, #tpu.memory_space<smem>>, %arg2: memref<16x256xbf16, #tpu.memory_space<vmem>>, %arg3: memref<256x128xbf16, #tpu.memory_space<vmem>>, %arg4: memref<1x128xf32, #tpu.memory_space<vmem>>, %arg5: memref<128x128xbf16, #tpu.memory_space<vmem>>, %arg6: memref<1x128xf32, #tpu.memory_space<vmem>>, %arg7: memref<128x128xbf16, #tpu.memory_space<vmem>>, %arg8: memref<1x128xf32, #tpu.memory_space<vmem>>, %arg9: memref<16x128xf32, #tpu.memory_space<vmem>>) attributes {dimension_semantics = [#tpu.dimension_semantics<parallel>], iteration_bounds = array<i64: 1>, scalar_prefetch = 1 : i64, scratch_operands = 0 : i64, tpu.core_type = #tpu.core_type<tc>, window_params = [{transform_indices = @transform_0, window_bounds = array<i64: 16, 256>}, {pipeline_mode = #tpu.pipeline_mode<synchronous>, transform_indices = @transform_1, window_bounds = array<i64: 256, 128>}, {pipeline_mode = #tpu.pipeline_mode<synchronous>, transform_indices = @transform_2, window_bounds = array<i64: 1, 128>}, {pipeline_mode = #tpu.pipeline_mode<synchronous>, transform_indices = @transform_3, window_bounds = array<i64: 128, 128>}, {pipeline_mode = #tpu.pipeline_mode<synchronous>, transform_indices = @transform_4, window_bounds = array<i64: 1, 128>}, {pipeline_mode = #tpu.pipeline_mode<synchronous>, transform_indices = @transform_5, window_bounds = array<i64: 128, 128>}, {pipeline_mode = #tpu.pipeline_mode<synchronous>, transform_indices = @transform_6, window_bounds = array<i64: 1, 128>}, {transform_indices = @transform_7, window_bounds = array<i64: 16, 128>}]} {
    %c0 = arith.constant 0 : index
    %0 = memref.load %arg1[%c0] : memref<1xi32, #tpu.memory_space<smem>>
    %c-1640531535_i32 = arith.constant -1640531535 : i32
    %1 = arith.muli %0, %c-1640531535_i32 : i32
    %c-1028477387_i32 = arith.constant -1028477387 : i32
    %2 = arith.muli %arg0, %c-1028477387_i32 : i32
    %3 = arith.addi %1, %2 : i32
    %c0_0 = arith.constant 0 : index
    %c0_1 = arith.constant 0 : index
    %4 = vector.load %arg2[%c0_0, %c0_1] : memref<16x256xbf16, #tpu.memory_space<vmem>>, vector<16x256xbf16>
    %c0_2 = arith.constant 0 : index
    %c0_3 = arith.constant 0 : index
    %5 = vector.load %arg3[%c0_2, %c0_3] : memref<256x128xbf16, #tpu.memory_space<vmem>>, vector<256x128xbf16>
    %cst = arith.constant dense<0.000000e+00> : vector<16x128xf32>
    %6 = tpu.matmul %4, %5, %cst {dimension_numbers = #tpu.dot_dimension_numbers<[1], [0], [0], [1], [0, 0, 1, 1], [], []>} : vector<16x256xbf16>, vector<256x128xbf16>, vector<16x128xf32> -> vector<16x128xf32>
    %c0_4 = arith.constant 0 : index
    %c0_5 = arith.constant 0 : index
    %7 = vector.load %arg4[%c0_4, %c0_5] : memref<1x128xf32, #tpu.memory_space<vmem>>, vector<1x128xf32>
    %8 = vector.broadcast %7 : vector<1x128xf32> to vector<16x128xf32>
    %9 = arith.addf %6, %8 : vector<16x128xf32>
    %cst_6 = arith.constant 0.000000e+00 : f32
    %10 = vector.broadcast %cst_6 : f32 to vector<16x128xf32>
    %11 = arith.maximumf %9, %10 : vector<16x128xf32>
    %c1_i32 = arith.constant 1 : i32
    %12 = arith.addi %3, %c1_i32 : i32
    %13 = tpu.iota {dimensions = array<i32: 0>} : vector<16x128xi32>
    %14 = tpu.iota {dimensions = array<i32: 1>} : vector<16x128xi32>
    %c-1640531535_i32_7 = arith.constant -1640531535 : i32
    %15 = vector.broadcast %c-1640531535_i32_7 : i32 to vector<16x128xi32>
    %16 = arith.muli %13, %15 : vector<16x128xi32>
    %17 = vector.broadcast %12 : i32 to vector<16x128xi32>
    %18 = arith.addi %17, %16 : vector<16x128xi32>
    %c-2048144777_i32 = arith.constant -2048144777 : i32
    %19 = vector.broadcast %c-2048144777_i32 : i32 to vector<16x128xi32>
    %20 = arith.muli %14, %19 : vector<16x128xi32>
    %21 = arith.addi %18, %20 : vector<16x128xi32>
    %c16_i32 = arith.constant 16 : i32
    %22 = vector.broadcast %c16_i32 : i32 to vector<16x128xi32>
    %23 = arith.shrui %21, %22 : vector<16x128xi32>
    %24 = arith.xori %21, %23 : vector<16x128xi32>
    %c2146121005_i32 = arith.constant 2146121005 : i32
    %25 = vector.broadcast %c2146121005_i32 : i32 to vector<16x128xi32>
    %26 = arith.muli %24, %25 : vector<16x128xi32>
    %c15_i32 = arith.constant 15 : i32
    %27 = vector.broadcast %c15_i32 : i32 to vector<16x128xi32>
    %28 = arith.shrui %26, %27 : vector<16x128xi32>
    %29 = arith.xori %26, %28 : vector<16x128xi32>
    %c-2073254261_i32 = arith.constant -2073254261 : i32
    %30 = vector.broadcast %c-2073254261_i32 : i32 to vector<16x128xi32>
    %31 = arith.muli %29, %30 : vector<16x128xi32>
    %c16_i32_8 = arith.constant 16 : i32
    %32 = vector.broadcast %c16_i32_8 : i32 to vector<16x128xi32>
    %33 = arith.shrui %31, %32 : vector<16x128xi32>
    %34 = arith.xori %31, %33 : vector<16x128xi32>
    %c858993459_i32 = arith.constant 858993459 : i32
    %35 = vector.broadcast %c858993459_i32 : i32 to vector<16x128xi32>
    %36 = arith.cmpi uge, %34, %35 : vector<16x128xi32>
    %cst_9 = arith.constant 1.250000e+00 : f32
    %37 = vector.broadcast %cst_9 : f32 to vector<16x128xf32>
    %38 = arith.mulf %11, %37 : vector<16x128xf32>
    %cst_10 = arith.constant 0.000000e+00 : f32
    %39 = vector.broadcast %cst_10 : f32 to vector<16x128xf32>
    %40 = arith.select %36, %38, %39 : vector<16x128xi1>, vector<16x128xf32>
    %41 = arith.truncf %40 : vector<16x128xf32> to vector<16x128xbf16>
    %c0_11 = arith.constant 0 : index
    %c0_12 = arith.constant 0 : index
    %42 = vector.load %arg5[%c0_11, %c0_12] : memref<128x128xbf16, #tpu.memory_space<vmem>>, vector<128x128xbf16>
    %cst_13 = arith.constant dense<0.000000e+00> : vector<16x128xf32>
    %43 = tpu.matmul %41, %42, %cst_13 {dimension_numbers = #tpu.dot_dimension_numbers<[1], [0], [0], [1], [0, 0, 1, 1], [], []>} : vector<16x128xbf16>, vector<128x128xbf16>, vector<16x128xf32> -> vector<16x128xf32>
    %c0_14 = arith.constant 0 : index
    %c0_15 = arith.constant 0 : index
    %44 = vector.load %arg6[%c0_14, %c0_15] : memref<1x128xf32, #tpu.memory_space<vmem>>, vector<1x128xf32>
    %45 = vector.broadcast %44 : vector<1x128xf32> to vector<16x128xf32>
    %46 = arith.addf %43, %45 : vector<16x128xf32>
    %cst_16 = arith.constant 0.000000e+00 : f32
    %47 = vector.broadcast %cst_16 : f32 to vector<16x128xf32>
    %48 = arith.maximumf %46, %47 : vector<16x128xf32>
    %c2_i32 = arith.constant 2 : i32
    %49 = arith.addi %3, %c2_i32 : i32
    %50 = tpu.iota {dimensions = array<i32: 0>} : vector<16x128xi32>
    %51 = tpu.iota {dimensions = array<i32: 1>} : vector<16x128xi32>
    %c-1640531535_i32_17 = arith.constant -1640531535 : i32
    %52 = vector.broadcast %c-1640531535_i32_17 : i32 to vector<16x128xi32>
    %53 = arith.muli %50, %52 : vector<16x128xi32>
    %54 = vector.broadcast %49 : i32 to vector<16x128xi32>
    %55 = arith.addi %54, %53 : vector<16x128xi32>
    %c-2048144777_i32_18 = arith.constant -2048144777 : i32
    %56 = vector.broadcast %c-2048144777_i32_18 : i32 to vector<16x128xi32>
    %57 = arith.muli %51, %56 : vector<16x128xi32>
    %58 = arith.addi %55, %57 : vector<16x128xi32>
    %c16_i32_19 = arith.constant 16 : i32
    %59 = vector.broadcast %c16_i32_19 : i32 to vector<16x128xi32>
    %60 = arith.shrui %58, %59 : vector<16x128xi32>
    %61 = arith.xori %58, %60 : vector<16x128xi32>
    %c2146121005_i32_20 = arith.constant 2146121005 : i32
    %62 = vector.broadcast %c2146121005_i32_20 : i32 to vector<16x128xi32>
    %63 = arith.muli %61, %62 : vector<16x128xi32>
    %c15_i32_21 = arith.constant 15 : i32
    %64 = vector.broadcast %c15_i32_21 : i32 to vector<16x128xi32>
    %65 = arith.shrui %63, %64 : vector<16x128xi32>
    %66 = arith.xori %63, %65 : vector<16x128xi32>
    %c-2073254261_i32_22 = arith.constant -2073254261 : i32
    %67 = vector.broadcast %c-2073254261_i32_22 : i32 to vector<16x128xi32>
    %68 = arith.muli %66, %67 : vector<16x128xi32>
    %c16_i32_23 = arith.constant 16 : i32
    %69 = vector.broadcast %c16_i32_23 : i32 to vector<16x128xi32>
    %70 = arith.shrui %68, %69 : vector<16x128xi32>
    %71 = arith.xori %68, %70 : vector<16x128xi32>
    %c858993459_i32_24 = arith.constant 858993459 : i32
    %72 = vector.broadcast %c858993459_i32_24 : i32 to vector<16x128xi32>
    %73 = arith.cmpi uge, %71, %72 : vector<16x128xi32>
    %cst_25 = arith.constant 1.250000e+00 : f32
    %74 = vector.broadcast %cst_25 : f32 to vector<16x128xf32>
    %75 = arith.mulf %48, %74 : vector<16x128xf32>
    %cst_26 = arith.constant 0.000000e+00 : f32
    %76 = vector.broadcast %cst_26 : f32 to vector<16x128xf32>
    %77 = arith.select %73, %75, %76 : vector<16x128xi1>, vector<16x128xf32>
    %78 = arith.truncf %77 : vector<16x128xf32> to vector<16x128xbf16>
    %c0_27 = arith.constant 0 : index
    %c0_28 = arith.constant 0 : index
    %79 = vector.load %arg7[%c0_27, %c0_28] : memref<128x128xbf16, #tpu.memory_space<vmem>>, vector<128x128xbf16>
    %cst_29 = arith.constant dense<0.000000e+00> : vector<16x128xf32>
    %80 = tpu.matmul %78, %79, %cst_29 {dimension_numbers = #tpu.dot_dimension_numbers<[1], [0], [0], [1], [0, 0, 1, 1], [], []>} : vector<16x128xbf16>, vector<128x128xbf16>, vector<16x128xf32> -> vector<16x128xf32>
    %c0_30 = arith.constant 0 : index
    %c0_31 = arith.constant 0 : index
    %81 = vector.load %arg8[%c0_30, %c0_31] : memref<1x128xf32, #tpu.memory_space<vmem>>, vector<1x128xf32>
    %82 = vector.broadcast %81 : vector<1x128xf32> to vector<16x128xf32>
    %83 = arith.addf %80, %82 : vector<16x128xf32>
    %cst_32 = arith.constant dense<0xFF800000> : vector<16xf32>
    %84 = vector.multi_reduction <maximumf>, %83, %cst_32 [1] : vector<16x128xf32> to vector<16xf32>
    %85 = vector.shape_cast %84 : vector<16xf32> to vector<16x1xf32>
    %86 = vector.broadcast %85 : vector<16x1xf32> to vector<16x128xf32>
    %87 = arith.subf %83, %86 : vector<16x128xf32>
    %88 = math.exp %87 : vector<16x128xf32>
    %cst_33 = arith.constant dense<0.000000e+00> : vector<16xf32>
    %89 = vector.multi_reduction <add>, %88, %cst_33 [1] : vector<16x128xf32> to vector<16xf32>
    %90 = vector.shape_cast %89 : vector<16xf32> to vector<16x1xf32>
    %91 = math.log %90 : vector<16x1xf32>
    %92 = arith.addf %85, %91 : vector<16x1xf32>
    %93 = vector.broadcast %92 : vector<16x1xf32> to vector<16x128xf32>
    %94 = arith.subf %83, %93 : vector<16x128xf32>
    %c0_34 = arith.constant 0 : index
    %c0_35 = arith.constant 0 : index
    %95 = vector.load %arg9[%c0_34, %c0_35] : memref<16x128xf32, #tpu.memory_space<vmem>>, vector<16x128xf32>
    tpu.vector_store %arg9[%c0_34, %c0_35], %94 {strides = array<i32>} : memref<16x128xf32, #tpu.memory_space<vmem>>, vector<16x128xf32>,
    return
  }
  func.func @transform_0(%arg0: i32, %arg1: memref<1xi32, #tpu.memory_space<smem>>) -> (i32, i32) {
    %c0_i32 = arith.constant 0 : i32
    %c0_i32_0 = arith.constant 0 : i32
    return %arg0, %c0_i32 : i32, i32
  }
  func.func @transform_1(%arg0: i32, %arg1: memref<1xi32, #tpu.memory_space<smem>>) -> (i32, i32) {
    %c0_i32 = arith.constant 0 : i32
    %c0_i32_0 = arith.constant 0 : i32
    %c0_i32_1 = arith.constant 0 : i32
    return %c0_i32, %c0_i32_0 : i32, i32
  }
  func.func @transform_2(%arg0: i32, %arg1: memref<1xi32, #tpu.memory_space<smem>>) -> (i32, i32) {
    %c0_i32 = arith.constant 0 : i32
    %c0_i32_0 = arith.constant 0 : i32
    %c0_i32_1 = arith.constant 0 : i32
    return %c0_i32, %c0_i32_0 : i32, i32
  }
  func.func @transform_3(%arg0: i32, %arg1: memref<1xi32, #tpu.memory_space<smem>>) -> (i32, i32) {
    %c0_i32 = arith.constant 0 : i32
    %c0_i32_0 = arith.constant 0 : i32
    %c0_i32_1 = arith.constant 0 : i32
    return %c0_i32, %c0_i32_0 : i32, i32
  }
  func.func @transform_4(%arg0: i32, %arg1: memref<1xi32, #tpu.memory_space<smem>>) -> (i32, i32) {
    %c0_i32 = arith.constant 0 : i32
    %c0_i32_0 = arith.constant 0 : i32
    %c0_i32_1 = arith.constant 0 : i32
    return %c0_i32, %c0_i32_0 : i32, i32
  }
  func.func @transform_5(%arg0: i32, %arg1: memref<1xi32, #tpu.memory_space<smem>>) -> (i32, i32) {
    %c0_i32 = arith.constant 0 : i32
    %c0_i32_0 = arith.constant 0 : i32
    %c0_i32_1 = arith.constant 0 : i32
    return %c0_i32, %c0_i32_0 : i32, i32
  }
  func.func @transform_6(%arg0: i32, %arg1: memref<1xi32, #tpu.memory_space<smem>>) -> (i32, i32) {
    %c0_i32 = arith.constant 0 : i32
    %c0_i32_0 = arith.constant 0 : i32
    %c0_i32_1 = arith.constant 0 : i32
    return %c0_i32, %c0_i32_0 : i32, i32
  }
  func.func @transform_7(%arg0: i32, %arg1: memref<1xi32, #tpu.memory_space<smem>>) -> (i32, i32) {
    %c0_i32 = arith.constant 0 : i32
    %c0_i32_0 = arith.constant 0 : i32
    return %arg0, %c0_i32 : i32, i32
  }
}

</mosaic_0001>

<bundles_post_ra>
// kernel: tpu_custom_call.1
= control target key start
LH: loop header
LB: loop body
LE: loop exit
PB: predicated region body
PF: predicated region fallthrough
CT: control target
= control target key end

     0   :  { %14 = vsyncpa [#allocation5], 0  ;;  %s993_s0 = inlined_call_operand.<no memory space> [shape: s32[1], index: 0, kind: input, shape index: {}]   ;;  %s994_s1 = inlined_call_operand.hbm [shape: bf16[16,256], index: 1, kind: input, shape index: {}]   ;;  %s995_s2 = inlined_call_operand.hbm [shape: bf16[256,128], index: 2, kind: input, shape index: {}]   ;;  %s996_s3 = inlined_call_operand.vmem [shape: f32[1,128], index: 3, kind: input, shape index: {}]   ;;  %s997_s4 = inlined_call_operand.hbm [shape: bf16[128,128], index: 4, kind: input, shape index: {}]   ;;  %s998_s5 = inlined_call_operand.vmem [shape: f32[1,128], index: 5, kind: input, shape index: {}]   ;;  %s999_s6 = inlined_call_operand.hbm [shape: bf16[128,128], index: 6, kind: input, shape index: {}]   ;;  %s1000_s7 = inlined_call_operand.vmem [shape: f32[1,128], index: 7, kind: input, shape index: {}]   ;;  %s1001_s8 = inlined_call_operand.hbm [shape: f32[16,128], index: 8, kind: output, shape index: {}]  }
   0x1   :  { %15 = vsyncpa [#allocation8], 0 }
   0x2   :  { %16 = vsyncpa [#allocation11], 0  ;;  %s35_s29 = sshll.u32 %s995_s2, 4  ;;  %s36_s29 = int_to_ptr.hbm [resolvable:$true] %s35_s29 }
   0x3   :  { %17 = vsyncpa [#allocation6], 0  ;;  %s883_s30 = smov [#allocation7]   ;;  %s22_s12 = sshll.u32 %s994_s1, 4  ;;  %s23_s12 = int_to_ptr.hbm [resolvable:$true] %s22_s12 }
   0x4   :  { %s37_s9 = sshll.u32 %s883_s30, 4  ;;  %s884_s13 = smov 64   ;;  %s38_s9 = int_to_ptr.vmem [resolvable:$true] %s37_s9 }
   0x5   :  { %s885_s14 = smov 4   ;;  %s886_s15 = smov [#allocation4]  }
   0x6   :  { %43 = dma.hbm_to_vmem [thread:$0]  %s36_s29, 2048, %s38_s9, [#allocation8], %s884_s13, %s884_s13, %s885_s14  }
   0x7   :  { %s24_s16 = sshll.u32 %s886_s15, 4  ;;  %s887_s17 = smov 128   ;;  %s25_s16 = int_to_ptr.vmem [resolvable:$true] %s24_s16 }
   0x8   :  { %s888_s18 = smov 8   ;;  %s50_s20 = sshll.u32 %s997_s4, 4  ;;  %s51_s20 = int_to_ptr.hbm [resolvable:$true] %s50_s20 }
   0x9   :  { %30 = dma.hbm_to_vmem [thread:$0]  %s23_s12, 256, %s25_s16, [#allocation5], %s887_s17, %s887_s17, %s888_s18  }
   0xa   :  { %s889_s21 = smov [#allocation9]   ;;  %s65_s24 = sshll.u32 %s999_s6, 4  ;;  %s66_s24 = int_to_ptr.hbm [resolvable:$true] %s65_s24 }
   0xb   :  { %s52_s1 = sshll.u32 %s889_s21, 4  ;;  %s890_s25 = smov [#allocation10]   ;;  %s53_s1 = int_to_ptr.vmem [resolvable:$true] %s52_s1 }
   0xc   :  { %58 = dma.hbm_to_vmem [thread:$0]  %s51_s20, 1024, %s53_s1, [#allocation8], %s884_s13, %s884_s13, %s885_s14  }
   0xd   :  { %s67_s26 = sshll.u32 %s890_s25, 4  ;;  %s68_s26 = int_to_ptr.vmem [resolvable:$true] %s67_s26 }
   0xe   :  { %73 = dma.hbm_to_vmem [thread:$0]  %s66_s24, 1024, %s68_s26, [#allocation11], %s884_s13, %s884_s13, %s885_s14  }
   0xf   :  { %875 = dma.done.wait [#allocation5], 256  }
  0x10   :  { %876 = vsyncadd [#allocation5], 4294967040 }
  0x11   :  { %877 = dma.done.wait [#allocation8], 3072  }
  0x12   :  { %878 = vsyncadd [#allocation8], 4294964224 }
  0x13   :  { %879 = dma.done.wait [#allocation11], 1024  }
  0x14   :  { %880 = vsyncadd [#allocation11], 4294966272  ;;  %v710_v0 = vld [vmem:[#allocation7 + $0x38] sm:$0xff]  ;;  %v709_v2 = vld [vmem:[#allocation7 + $0x30] sm:$0xff]  ;;  %v271_v25 = vlaneseq  ;;  %s93_s27 = smul.u32 2654435761, %s993_s0 }
  0x15   :  { %v718_v1 = vld [vmem:[#allocation7 + $0x78] sm:$0xff]  ;;  %240 = vmatpush.bf16.msra.mxu0 %v710_v0  ;;  %v717_v3 = vld [vmem:[#allocation7 + $0x70] sm:$0xff]  ;;  %v708_v4 = vld [vmem:[#allocation7 + $0x28] sm:$0xff]  ;;  %s540_s19 = sshll.u32 %s1001_s8, 4  ;;  %s541_s19 = int_to_ptr.hbm [resolvable:$true] %s540_s19 }
  0x16   :  { %254 = vmatpush.bf16.msra.mxu1 %v718_v1  ;;  %v716_v5 = vld [vmem:[#allocation7 + $0x68] sm:$0xff]  ;;  %v726_v6 = vld [vmem:[#allocation9 + $0x38] sm:$0xff]  ;;  %v725_v7 = vld [vmem:[#allocation9 + $0x30] sm:$0xff]  ;;  %v952_v26 = vshrl.u32 %v271_v25, 7  ;;  %s270_s30 = sadd.s32 1, %s93_s27  ;;  %v275_v28 = vand.u32 127, %v271_v25 }
  0x17   :  { %379 = vmatpush.bf16.msra.mxu2 %v726_v6  ;;  %v707_v8 = vld [vmem:[#allocation7 + $0x20] sm:$0xff]  ;;  %v724_v10 = vld [vmem:[#allocation9 + $0x28] sm:$0xff]  ;;  %v706_v11 = vld [vmem:[#allocation7 + $0x18] sm:$0xff]  ;;  %v278_v32 = vstv %s270_s30  ;;  %s395_s12 = sadd.s32 2, %s93_s27 }
  0x18   :  { %v715_v9 = vld [vmem:[#allocation7 + $0x60] sm:$0xff]  ;;  %v714_v12 = vld [vmem:[#allocation7 + $0x58] sm:$0xff]  ;;  %v705_v13 = vld [vmem:[#allocation7 + $0x10] sm:$0xff]  ;;  %v958_v27 = vadd.s32 8, %v952_v26  ;;  %v276_v29 = vmul.u32 2654435761, %v952_v26 }
  0x19   :  { %241 = vmatpush.bf16.msra.mxu0 %v709_v2  ;;  %v713_v14 = vld [vmem:[#allocation7 + $0x50] sm:$0xff]  ;;  %v704_v15 = vld [vmem:[#allocation7 + $0x8] sm:$0xff]  ;;  %v703_v17 = vld [vmem:[#allocation7] sm:$0xff]  ;;  %v281_v35 = vmul.u32 2246822519, %v275_v28 }
  0x1a   :  { %255 = vmatpush.bf16.msra.mxu1 %v717_v3  ;;  %v712_v16 = vld [vmem:[#allocation7 + $0x48] sm:$0xff]  ;;  %v711_v18 = vld [vmem:[#allocation7 + $0x40] sm:$0xff]  ;;  %v557_v19 = vld [vmem:[#allocation4] sm:$0xf]  ;;  %v277_v30 = vmul.u32 2654435761, %v958_v27  ;;  %v279_v33 = vadd.s32 %v278_v32, %v276_v29 }
  0x1b   :  { %380 = vmatpush.bf16.msra.mxu2 %v725_v7  ;;  %v702_v20 = vld [vmem:[#allocation4 + $0x4] sm:$0xf0]  ;;  %v701_v21 = vld [vmem:[#allocation4 + $0x4] sm:$0xf]  ;;  %v559_v22 = vld [vmem:[#allocation4 + $0x8] sm:$0xf0] }
  0x1c   :  { %v558_v23 = vor.u32 %v702_v20, %v557_v19  ;;  %v562_v24 = vor.u32 %v701_v21, %v559_v22  ;;  %v723_v31 = vld [vmem:[#allocation9 + $0x20] sm:$0xff]  ;;  %v280_v34 = vadd.s32 %v278_v32, %v277_v30  ;;  %v722_v36 = vld [vmem:[#allocation9 + $0x18] sm:$0xff]  ;;  %v282_v37 = vadd.s32 %v281_v35, %v279_v33  ;;  %v721_v39 = vld [vmem:[#allocation9 + $0x10] sm:$0xff] }
  0x1d   :  { %242 = vmatpush.bf16.msra.mxu0 %v708_v4  ;;  %v720_v42 = vld [vmem:[#allocation9 + $0x8] sm:$0xff]  ;;  %v719_v45 = vld [vmem:[#allocation9] sm:$0xff]  ;;  %v734_v48 = vld [vmem:[#allocation10 + $0x38] sm:$0xff] }
  0x1e   :  { %256 = vmatpush.bf16.msra.mxu1 %v716_v5  ;;  %v283_v38 = vadd.s32 %v281_v35, %v280_v34  ;;  %v284_v40 = vshrl.u32 %v282_v37, 16  ;;  %496 = vmatpush.bf16.msra.mxu3 %v734_v48  ;;  %v733_v51 = vld [vmem:[#allocation10 + $0x30] sm:$0xff]  ;;  %v732_v54 = vld [vmem:[#allocation10 + $0x28] sm:$0xff]  ;;  %v731_v57 = vld [vmem:[#allocation10 + $0x20] sm:$0xff] }
  0x1f   :  { %381 = vmatpush.bf16.msra.mxu2 %v724_v10  ;;  %v744_v58 = vld [vmem:[%s996_s3] ss:$0 sm:$0xff]  ;;  %v727_v28 = vld [vmem:[#allocation10] sm:$0xff] }
  0x20   :  { %v285_v41 = vshrl.u32 %v283_v38, 16  ;;  %v286_v43 = vxor.u32 %v284_v40, %v282_v37  ;;  %v729_v20 = vld [vmem:[#allocation10 + $0x10] sm:$0xff] }
  0x21   :  { %243 = vmatpush.bf16.msra.mxu0 %v707_v8 }
  0x22   :  { %257 = vmatpush.bf16.msra.mxu1 %v715_v9  ;;  %v287_v44 = vxor.u32 %v285_v41, %v283_v38  ;;  %v288_v46 = vmul.u32 2146121005, %v286_v43  ;;  %497 = vmatpush.bf16.msra.mxu3 %v733_v51  ;;  %v745_v38 = vld [vmem:[%s998_s5] ss:$0 sm:$0xff]  ;;  %s891_s5 = smov [#allocation12]  }
  0x23   :  { %382 = vmatpush.bf16.msra.mxu2 %v723_v31  ;;  %v746_v51 = vld [vmem:[%s1000_s7] ss:$0 sm:$0xff]  ;;  %s538_s7 = sshll.u32 %s891_s5, 4  ;;  %s539_s7 = int_to_ptr.vmem [resolvable:$true] %s538_s7 }
  0x24   :  { %v289_v47 = vmul.u32 2146121005, %v287_v44  ;;  %v290_v49 = vshrl.u32 %v288_v46, 15 }
  0x25   :  { %244 = vmatpush.bf16.msra.mxu0 %v706_v11 }
  0x26   :  { %258 = vmatpush.bf16.msra.mxu1 %v714_v12  ;;  %v291_v50 = vshrl.u32 %v289_v47, 15  ;;  %v292_v52 = vxor.u32 %v290_v49, %v288_v46  ;;  %498 = vmatpush.bf16.msra.mxu3 %v732_v54 }
  0x27   :  { %383 = vmatpush.bf16.msra.mxu2 %v722_v36 }
  0x28   :  { %v293_v53 = vxor.u32 %v291_v50, %v289_v47  ;;  %v294_v55 = vmul.u32 2221713035, %v292_v52 }
  0x29   :  { %245 = vmatpush.bf16.msra.mxu0 %v705_v13 }
  0x2a   :  { %259 = vmatpush.bf16.msra.mxu1 %v713_v14  ;;  %v295_v56 = vmul.u32 2221713035, %v293_v53  ;;  %v296_v61 = vshrl.u32 %v294_v55, 16  ;;  %499 = vmatpush.bf16.msra.mxu3 %v731_v57  ;;  %v396_v14 = vstv %s395_s12 }
  0x2b   :  { %384 = vmatpush.bf16.msra.mxu2 %v721_v39 }
  0x2c   :  { %v297_v62 = vshrl.u32 %v295_v56, 16  ;;  %v298_v0 = vxor.u32 %v296_v61, %v294_v55 }
  0x2d   :  { %246 = vmatpush.bf16.msra.mxu0 %v704_v15  ;;  %v397_v15 = vadd.s32 %v396_v14, %v276_v29 }
  0x2e   :  { %260 = vmatpush.bf16.msra.mxu1 %v712_v16  ;;  %v299_v1 = vxor.u32 %v297_v62, %v295_v56  ;;  %v627_v5 = vxor.u32 2147483648, %v298_v0  ;;  %v398_v16 = vadd.s32 %v396_v14, %v277_v30 }
  0x2f   :  { %385 = vmatpush.bf16.msra.mxu2 %v720_v42 }
  0x30   :  { %v628_v6 = vxor.u32 2147483648, %v299_v1  ;;  %vm302_vm0 = vcmp.ge.s32.totalorder %v627_v5, 3006477107  ;;  %v400_v19 = vadd.s32 %v398_v16, %v281_v35 }
  0x31   :  { %247 = vmatpush.bf16.msra.mxu0 %v703_v17  ;;  %v730_v17 = vld [vmem:[#allocation10 + $0x18] sm:$0xff] }
  0x32   :  { %261 = vmatpush.bf16.msra.mxu1 %v711_v18  ;;  %vm305_vm1 = vcmp.ge.s32.totalorder %v628_v6, 3006477107  ;;  %500 = vmatpush.bf16.msra.mxu3 %v730_v17  ;;  %v399_v18 = vadd.s32 %v397_v15, %v281_v35  ;;  %v402_v22 = vshrl.u32 %v400_v19, 16 }
  0x33   :  { %386 = vmatpush.bf16.msra.mxu2 %v719_v45  ;;  %vm661_vm2 = vmpackc.low %vm305_vm1, %vm302_vm0 }
  0x34   :  { %248 = vmatmul.bf16.vlgmr.msra.gmra.mxu0 %v558_v23  ;;  %v401_v21 = vshrl.u32 %v399_v18, 16  ;;  %v728_v23 = vld [vmem:[#allocation10 + $0x8] sm:$0xff]  ;;  %v404_v25 = vxor.u32 %v402_v22, %v400_v19 }
  0x35   :  { %262 = vmatmul.bf16.vlgmr.msra.gmra.mxu1 %v562_v24 }
  0x36   :  { %501 = vmatpush.bf16.msra.mxu3 %v729_v20  ;;  %v403_v24 = vxor.u32 %v401_v21, %v399_v18  ;;  %v406_v26 = vmul.u32 2146121005, %v404_v25 }
  0x38   :  { %v405_v31 = vmul.u32 2146121005, %v403_v24  ;;  %v408_v32 = vshrl.u32 %v406_v26, 15 }
  0x3a   :  { %502 = vmatpush.bf16.msra.mxu3 %v728_v23  ;;  %v407_v29 = vshrl.u32 %v405_v31, 15  ;;  %v410_v30 = vxor.u32 %v408_v32, %v406_v26 }
  0x3c   :  { %v409_v27 = vxor.u32 %v407_v29, %v405_v31  ;;  %v412_v34 = vmul.u32 2221713035, %v410_v30 }
  0x3e   :  { %503 = vmatpush.bf16.msra.mxu3 %v727_v28  ;;  %v411_v33 = vmul.u32 2221713035, %v409_v27  ;;  %v414_v35 = vshrl.u32 %v412_v34, 16 }
  0x40   :  { %v413_v36 = vshrl.u32 %v411_v33, 16  ;;  %v416_v40 = vxor.u32 %v414_v35, %v412_v34 }
  0x42   :  { %v415_v39 = vxor.u32 %v413_v36, %v411_v33  ;;  %v665_v43 = vxor.u32 2147483648, %v416_v40 }
  0x44   :  { %v664_v42 = vxor.u32 2147483648, %v415_v39  ;;  %vm422_vm4 = vcmp.ge.s32.totalorder %v665_v43, 3006477107 }
  0x46   :  { %vm419_vm3 = vcmp.ge.s32.totalorder %v664_v42, 3006477107 }
  0x47   :  { %vm698_vm5 = vmpackc.low %vm422_vm4, %vm419_vm3 }
  0xb1   :  { %v249_v59 = vpop.f32.mrf.mxu0 }
  0xb2   :  { %v263_v60 = vpop.f32.mrf.mxu1  ;;  %v250_v63 = vadd.f32 %v744_v58, %v249_v59 }
  0xb4   :  { %v264_v2 = vadd.f32 %v263_v60, %v250_v63 }
  0xb6   :  { %v268_v8 = vmax.f32 %v264_v2, 0.0 }
  0xb8   :  { %v306_v11 = vmul.f32 1.25, %v268_v8 }
  0xb9   :  { %v251_v3 = vpop.f32.mrf.mxu0 }
  0xba   :  { %v252_v4 = vadd.f32 %v744_v58, %v251_v3  ;;  %v265_v7 = vpop.f32.mrf.mxu1 }
  0xbc   :  { %v266_v9 = vadd.f32 %v265_v7, %v252_v4 }
  0xbe   :  { %v269_v10 = vmax.f32 %v266_v9, 0.0 }
  0xc0   :  { %v307_v12 = vmul.f32 1.25, %v269_v10 }
  0xc2   :  { %v662_v13 = vpack.c.bf16 %v307_v12, %v306_v11 }
  0xc4   :  { %663 = vmatmul.msk.bf16.vlgmr.msra.gmra.mxu2 %vm661_vm2, %v662_v13 }
 0x147   :  { %v388_v37 = vpop.f32.mrf.mxu2 }
 0x148   :  { %v389_v41 = vadd.f32 %v745_v38, %v388_v37 }
 0x14a   :  { %v393_v45 = vmax.f32 %v389_v41, 0.0 }
 0x14c   :  { %v423_v48 = vmul.f32 1.25, %v393_v45 }
 0x14f   :  { %v390_v44 = vpop.f32.mrf.mxu2 }
 0x150   :  { %v391_v46 = vadd.f32 %v745_v38, %v390_v44 }
 0x152   :  { %v394_v47 = vmax.f32 %v391_v46, 0.0 }
 0x154   :  { %v424_v49 = vmul.f32 1.25, %v394_v47 }
 0x156   :  { %v699_v50 = vpack.c.bf16 %v424_v49, %v423_v48 }
 0x158   :  { %700 = vmatmul.msk.bf16.vlgmr.msra.gmra.mxu3 %vm698_vm5, %v699_v50 }
 0x1db   :  { %v505_v52 = vpop.f32.mrf.mxu3 }
 0x1dc   :  { %v506_v53 = vadd.f32 %v746_v51, %v505_v52 }
 0x1de   :  { %510 = vmax.xlane.f32.xlu0 %v506_v53 }
 0x1e3   :  { %v507_v54 = vpop.f32.mrf.mxu3 }
 0x1e4   :  { %v508_v55 = vadd.f32 %v746_v51, %v507_v54 }
 0x1e6   :  { %512 = vmax.xlane.f32.xlu0 %v508_v55 }
 0x251   :  { %v511_v56 = vpop.xlane.xlu0 %510 }
 0x252   :  { %v514_v57 = vsub.f32 %v506_v53, %v511_v56 }
 0x254   :  { %v516_v58 = vmul.f32 1.442695, %v514_v57 }
 0x256   :  { %747 = vpow2.f32 %v516_v58 }
 0x259   :  { %v513_v59 = vpop.xlane.xlu0 %512 }
 0x25a   :  { %v515_v60 = vsub.f32 %v508_v55, %v513_v59 }
 0x25c   :  { %v748_v61 = vpop.eup %747  ;;  %v518_v62 = vmul.f32 1.442695, %v515_v60 }
 0x25d   :  { %520 = vadd.xlane.f32.xlu1 %v748_v61 }
 0x25e   :  { %749 = vpow2.f32 %v518_v62 }
 0x264   :  { %v750_v63 = vpop.eup %749 }
 0x265   :  { %522 = vadd.xlane.f32.xlu1 %v750_v63 }
 0x2d0   :  { %v521_v0 = vpop.xlane.xlu1 %520 }
 0x2d1   :  { %751 = vlog2.f32 %v521_v0 }
 0x2d7   :  { %v752_v1 = vpop.eup %751 }
 0x2d8   :  { %v525_v2 = vmul.f32 0.6931472, %v752_v1  ;;  %v523_v3 = vpop.xlane.xlu1 %522 }
 0x2d9   :  { %753 = vlog2.f32 %v523_v3 }
 0x2da   :  { %v528_v4 = vadd.f32 %v525_v2, %v511_v56 }
 0x2dc   :  { %v530_v5 = vsub.f32 %v506_v53, %v528_v4 }
 0x2de   :  { %532 = vst [vmem:[#allocation12] sm:$0xff] %v530_v5 }
 0x2df   :  { %v754_v6 = vpop.eup %753 }
 0x2e0   :  { %v527_v7 = vmul.f32 0.6931472, %v754_v6 }
 0x2e2   :  { %v529_v8 = vadd.f32 %v527_v7, %v513_v59 }
 0x2e4   :  { %v531_v9 = vsub.f32 %v508_v55, %v529_v8 }
 0x2e6   :  { %533 = vst [vmem:[#allocation12 + $0x8] sm:$0xff] %v531_v9 }
 0x2e7   :  { %546 = dma.vmem_to_hbm [thread:$0]  %s539_s7, 256, %s541_s19, [#allocation6], %s887_s17, %s887_s17, %s888_s18  }
 0x2e8   :  { %881 = dma.done.wait [#allocation6], 256  }
 0x2e9   :  { %882 = vsyncadd [#allocation6], 4294967040 }
 0x2ea   :  { %551 = vsyncpa [#allocation5], 1 }
 0x2eb   :  { %552 = vsyncpa [#allocation8], 1 }
 0x2ec   :  { %553 = vsyncpa [#allocation11], 1 }
 0x2ed   :  { %554 = vsyncpa [#allocation6], 1 }

</bundles_post_ra>
